<compile_context>
chip_gen: v5e
topology: v5e:2x2
jax: 0.10.0
libtpu: 0.0.40
codegen_flags: <defaults>
</compile_context>

<pallas_src>
import functools
import math

import jax
import jax.numpy as jnp
from jax.experimental import pallas as pl
from jax.experimental.pallas import tpu as pltpu

VMEM = pl.BlockSpec(memory_space=pltpu.MemorySpace.VMEM)


def _round_up(x, m):
    return ((x + m - 1) // m) * m


# ------------------------------ fused kernel -------------------------------- #

def decoder_fused_kernel(state_ref, w_ref, v_ref, pred_ref, hfinal_ref, *,
                         seq_len, h_dim, bneck, mlp_dim, b_pad, w_offs):
    f32 = jnp.float32
    H = h_dim
    o_whh, o_h2p, o_pw1h, o_pw2, o_mw1h, o_mw1p, o_mw2 = w_offs

    # ---- weight matrices: 8-aligned static windows of the packed slab ------ #
    whh = w_ref[o_whh:o_whh + H, 0:4 * H]            # (H, 4H), g-cols pre-scaled x2
    h2p_w = w_ref[o_h2p:o_h2p + H, 0:2]              # (H, 2)
    pp_w1h = w_ref[o_pw1h:o_pw1h + H, 0:H]           # (H, H)
    pp_w2 = w_ref[o_pw2:o_pw2 + H, 0:bneck]          # (H, bneck)
    mlp_w1h = w_ref[o_mw1h:o_mw1h + H, 0:mlp_dim]    # (H, MLP)
    mlp_w1p = w_ref[o_mw1p:o_mw1p + bneck, 0:mlp_dim]  # (bneck, MLP)
    mlp_w2 = w_ref[o_mw2:o_mw2 + mlp_dim, 0:H]       # (MLP, H)

    # ---- vector rows (biases + K=2 folded weights), one tiny slab ---------- #
    V = v_ref[...]
    wpos0 = V[0:1, 0:4 * H]          # spatial_embedding folded into LSTM, row 0
    wpos1 = V[1:2, 0:4 * H]          # row 1
    b_lstm = V[2:3, 0:4 * H]         # spe_b@wih + b_ih + b_hh (g-cols x2)
    h2p_b = V[3:4, 0:2]
    ppos0 = V[4:5, 0:H]              # pool spatial_embedding folded, row 0
    ppos1 = V[5:6, 0:H]              # row 1
    pp_b1 = V[6:7, 0:H]              # pp_b1 + pspe_b @ pp_w1e
    pp_b2 = V[7:8, 0:bneck]
    mlp_b1 = V[8:9, 0:mlp_dim]
    mlp_b2 = V[9:10, 0:H]

    # ---- state + static same-group mask ------------------------------------ #
    last_pos0 = state_ref[0:b_pad, 0:2]
    pos_in0 = state_ref[b_pad:2 * b_pad, 0:2]        # = last_pos_rel
    h0 = state_ref[2 * b_pad:3 * b_pad, 0:H]
    c0 = state_ref[3 * b_pad:4 * b_pad, 0:H]
    # mask2[j*b_pad + i, 0] = 1 iff pedestrians i and j belong to the same
    # sequence (and both are real rows).  Applied before the max; valid because
    # the masked values are ReLU outputs (>= 0).
    mask2 = state_ref[4 * b_pad:4 * b_pad + b_pad * b_pad, 0:1]

    lane = jax.lax.broadcasted_iota(jnp.int32, (b_pad, 4 * H), 1)
    is_g = (lane >= 2 * H) & (lane < 3 * H)

    def step(t, carry):
        h, c, last_pos, pos_in = carry

        # ---- LSTM cell (PyTorch gate order i,f,g,o); spatial embedding is
        #      folded into wpos so the position path is a VPU broadcast-FMA --- #
        gates = (pos_in[:, 0:1] * wpos0 + pos_in[:, 1:2] * wpos1
                 + jnp.dot(h, whh, preferred_element_type=f32) + b_lstm)
        s = jax.nn.sigmoid(gates)                     # single EUP pass
        act = jnp.where(is_g, 2.0 * s - 1.0, s)       # tanh(x) = 2*sigmoid(2x)-1
        gi = act[:, 0:H]
        gf = act[:, H:2 * H]
        gg = act[:, 2 * H:3 * H]
        go = act[:, 3 * H:4 * H]
        c = gf * c + gi * gg
        h_l = go * jnp.tanh(c)

        # ---- hidden2pos ---------------------------------------------------- #
        rel_pos = jnp.dot(h_l, h2p_w, preferred_element_type=f32) + h2p_b
        curr_pos = rel_pos + last_pos

        # ---- PoolHiddenNet: batched, masked pairwise pooling --------------- #
        # Pair (i query, j neighbour): relu((P_j-P_i)@pp_pos_w + H_j@pp_w1h + b)
        pe1 = curr_pos[:, 0:1] * ppos0 + curr_pos[:, 1:2] * ppos1   # (b, H)
        a = pe1 + jnp.dot(h_l, pp_w1h, preferred_element_type=f32) + pp_b1
        # rows k = j*b_pad + i  ->  a[j] - pe1[i]
        y = jnp.concatenate([a[j:j + 1, :] - pe1 for j in range(b_pad)], axis=0)
        y = jnp.maximum(y, 0.0)                                      # (b*b, H)
        z = jnp.maximum(jnp.dot(y, pp_w2, preferred_element_type=f32)
                        + pp_b2, 0.0)                                # (b*b, bneck)
        z = z * mask2                                                # mask b4 max
        pool_h = z[0:b_pad, :]
        for j in range(1, b_pad):                                    # static
            pool_h = jnp.maximum(pool_h, z[j * b_pad:(j + 1) * b_pad, :])

        # ---- decoder MLP (split weights; no concat) ------------------------ #
        dh = jnp.maximum(jnp.dot(h_l, mlp_w1h, preferred_element_type=f32)
                         + jnp.dot(pool_h, mlp_w1p, preferred_element_type=f32)
                         + mlp_b1, 0.0)
        h_new = jnp.maximum(jnp.dot(dh, mlp_w2, preferred_element_type=f32)
                            + mlp_b2, 0.0)

        pred_ref[t] = rel_pos                         # per-step aligned store
        return h_new, c, curr_pos, rel_pos

    h, _, _, _ = jax.lax.fori_loop(0, seq_len, step,
                                   (h0, c0, last_pos0, pos_in0))
    hfinal_ref[...] = h


# ------------------------------ wrapper ------------------------------------- #

def decoder_forward(p, last_pos, last_pos_rel, h0, c0, seq_start_end,
                    *, seq_len, h_dim):
    f32 = jnp.float32
    batch = last_pos.shape[0]
    H = h_dim
    b_pad = _round_up(batch, 8)
    emb_dim = p['spe_w'].shape[1]
    mlp_dim = p['mlp_w2'].shape[0]
    bneck = p['pp_w2'].shape[1]
    sse = tuple((int(s), int(e)) for (s, e) in seq_start_end)

    LW = _round_up(max(4 * H, mlp_dim, bneck, H, b_pad, 2), 128)

    # ---- exact algebraic folds (done once, host side) ----------------------- #
    # Decoder.spatial_embedding folded into LSTM input weights.
    wpos = p['spe_w'] @ p['wih']                          # (2, 4H)
    b_lstm = p['spe_b'] @ p['wih'] + p['b_lstm']          # (1, 4H)
    # tanh-via-sigmoid: double everything feeding the g-gate columns.
    gsc = jnp.ones((4 * H,), f32).at[2 * H:3 * H].set(2.0)
    wpos = wpos * gsc
    whh = p['whh'] * gsc
    b_lstm = b_lstm * gsc
    # PoolHiddenNet.spatial_embedding folded into first pre-pool layer.
    pp_w1e = p['pp_w1'][:emb_dim]
    pp_w1h = p['pp_w1'][emb_dim:]
    pp_pos_w = p['pspe_w'] @ pp_w1e                       # (2, H)
    pp_b1 = p['pp_b1'] + p['pspe_b'] @ pp_w1e             # (1, H)
    # Decoder MLP first layer: split concat([h, pool_h]) into two matmuls.
    mlp_w1h = p['mlp_w1'][:H]
    mlp_w1p = p['mlp_w1'][H:]

    # ---- pack weights into two VMEM slabs ----------------------------------- #
    def padlw(x):
        x = x.astype(f32)
        return jnp.pad(x, ((0, 0), (0, LW - x.shape[1])))

    w_mats = [whh, p['h2p_w'], pp_w1h, p['pp_w2'], mlp_w1h, mlp_w1p, p['mlp_w2']]
    parts, offs, r = [], [], 0
    for m in w_mats:
        rp = _round_up(m.shape[0], 8)
        offs.append(r)
        parts.append(jnp.pad(padlw(m), ((0, rp - m.shape[0]), (0, 0))))
        r += rp
    w_slab = jnp.concatenate(parts, axis=0)

    v_rows = [wpos[0:1], wpos[1:2], b_lstm, p['h2p_b'],
              pp_pos_w[0:1], pp_pos_w[1:2], pp_b1, p['pp_b2'],
              p['mlp_b1'], p['mlp_b2']]
    v_slab = jnp.concatenate([padlw(x) for x in v_rows], axis=0)
    v_slab = jnp.pad(
        v_slab, ((0, _round_up(v_slab.shape[0], 8) - v_slab.shape[0]), (0, 0)))

    # ---- pack state + static same-group mask into one slab ------------------ #
    def pad_state(x):
        x = x.astype(f32)
        return jnp.pad(x, ((0, b_pad - x.shape[0]), (0, LW - x.shape[1])))

    mask = jnp.zeros((b_pad, b_pad), f32)
    for (s, e) in sse:
        mask = mask.at[s:e, s:e].set(1.0)
    mask2 = mask.T.reshape(b_pad * b_pad, 1)   # row j*b_pad+i -> same_group(i,j)

    state_slab = jnp.concatenate([
        pad_state(last_pos),
        pad_state(last_pos_rel),
        pad_state(h0.reshape(batch, H)),
        pad_state(c0.reshape(batch, H)),
        jnp.pad(mask2, ((0, 0), (0, LW - 1))),
    ], axis=0)

    # ---- advisory cost estimate --------------------------------------------- #
    out_bytes = (seq_len * b_pad * 2 + b_pad * H) * 4
    nbytes = (state_slab.size + w_slab.size + v_slab.size) * 4 + out_bytes
    per_step_flops = (2 * b_pad * H * 4 * H + 2 * b_pad * H * 2
                      + 2 * b_pad * H * H + 2 * b_pad * b_pad * H * bneck
                      + 2 * b_pad * H * mlp_dim + 2 * b_pad * bneck * mlp_dim
                      + 2 * b_pad * mlp_dim * H)
    cost = pl.CostEstimate(flops=int(seq_len * per_step_flops),
                           transcendentals=int(seq_len * (5 * b_pad * H)),
                           bytes_accessed=int(nbytes))

    kern = functools.partial(
        decoder_fused_kernel, seq_len=seq_len, h_dim=H, bneck=bneck,
        mlp_dim=mlp_dim, b_pad=b_pad, w_offs=tuple(offs))

    # TODO(synk): for multi-scene / multi-sample batches, add a leading
    # "parallel" grid axis so v7x's second TensorCore is used.
    pred, h_final = pl.pallas_call(
        kern,
        out_shape=(jax.ShapeDtypeStruct((seq_len, b_pad, 2), f32),
                   jax.ShapeDtypeStruct((b_pad, H), f32)),
        in_specs=[VMEM, VMEM, VMEM],
        out_specs=(VMEM, VMEM),
        cost_estimate=cost,
    )(state_slab, w_slab, v_slab)

    return pred[:, :batch, :], h_final[:batch].reshape(1, batch, H)


# ------------------------------ parameters ---------------------------------- #

def init_params(key, emb_dim, h_dim, mlp_dim, bneck):
    ks = jax.random.split(key, 9)

    def lin(k, fan_in, fan_out):
        kw, kb = jax.random.split(k)
        bound = 1.0 / math.sqrt(fan_in)
        w = jax.random.uniform(kw, (fan_in, fan_out), jnp.float32, -bound, bound)
        b = jax.random.uniform(kb, (1, fan_out), jnp.float32, -bound, bound)
        return w, b

    # Fresh BatchNorm1d in eval mode (gamma=1, beta=0, mean=0, var=1, eps=1e-5)
    # folds into a uniform per-feature scale.
    bn_scale = 1.0 / math.sqrt(1.0 + 1e-5)

    p = {}
    # Decoder.spatial_embedding : Linear(2, emb_dim)
    p['spe_w'], p['spe_b'] = lin(ks[0], 2, emb_dim)
    # Decoder.decoder : LSTM(emb_dim, h_dim, 1)
    wih, bih = lin(ks[1], emb_dim, 4 * h_dim)
    whh, bhh = lin(ks[2], h_dim, 4 * h_dim)
    p['wih'], p['whh'], p['b_lstm'] = wih, whh, bih + bhh
    # Decoder.hidden2pos : Linear(h_dim, 2)
    p['h2p_w'], p['h2p_b'] = lin(ks[3], h_dim, 2)
    # PoolHiddenNet.spatial_embedding : Linear(2, emb_dim)
    p['pspe_w'], p['pspe_b'] = lin(ks[4], 2, emb_dim)
    # PoolHiddenNet.mlp_pre_pool : [emb+h, h, bottleneck] (BN folded)
    pp_w1, pp_b1 = lin(ks[5], emb_dim + h_dim, h_dim)
    pp_w2, pp_b2 = lin(ks[6], h_dim, bneck)
    p['pp_w1'], p['pp_b1'] = pp_w1 * bn_scale, pp_b1 * bn_scale
    p['pp_w2'], p['pp_b2'] = pp_w2 * bn_scale, pp_b2 * bn_scale
    # Decoder.mlp : [h+bottleneck, mlp_dim, h] (BN folded)
    mlp_w1, mlp_b1 = lin(ks[7], h_dim + bneck, mlp_dim)
    mlp_w2, mlp_b2 = lin(ks[8], mlp_dim, h_dim)
    p['mlp_w1'], p['mlp_b1'] = mlp_w1 * bn_scale, mlp_b1 * bn_scale
    p['mlp_w2'], p['mlp_b2'] = mlp_w2 * bn_scale, mlp_b2 * bn_scale
    return p


# ------------------------------ pure-JAX reference --------------------------- #

def reference_forward(p, last_pos, last_pos_rel, h0, c0, seq_start_end,
                      *, seq_len, h_dim):
    """Un-fused formulation mirroring the PyTorch module, for correctness."""
    batch = last_pos.shape[0]
    H = h_dim
    h = h0.reshape(batch, H)
    c = c0.reshape(batch, H)

    dec_in = last_pos_rel @ p['spe_w'] + p['spe_b']
    preds = []
    for _ in range(seq_len):
        gates = dec_in @ p['wih'] + h @ p['whh'] + p['b_lstm']
        gi = jax.nn.sigmoid(gates[:, 0:H])
        gf = jax.nn.sigmoid(gates[:, H:2 * H])
        gg = jnp.tanh(gates[:, 2 * H:3 * H])
        go = jax.nn.sigmoid(gates[:, 3 * H:4 * H])
        c = gf * c + gi * gg
        h = go * jnp.tanh(c)

        rel_pos = h @ p['h2p_w'] + p['h2p_b']
        curr_pos = rel_pos + last_pos

        pools = []
        for (s, e) in seq_start_end:
            n = e - s
            hid = h[s:e]
            pos = curr_pos[s:e]
            rel = jnp.tile(pos, (n, 1)) - jnp.repeat(pos, n, axis=0)
            emb = rel @ p['pspe_w'] + p['pspe_b']
            x = jnp.concatenate([emb, jnp.tile(hid, (n, 1))], axis=1)
            y = jnp.maximum(x @ p['pp_w1'] + p['pp_b1'], 0.0)
            z = jnp.maximum(y @ p['pp_w2'] + p['pp_b2'], 0.0)
            pools.append(jnp.max(z.reshape(n, n, -1), axis=1))
        pool_h = jnp.concatenate(pools, axis=0)

        dh = jnp.maximum(jnp.concatenate([h, pool_h], axis=1) @ p['mlp_w1']
                         + p['mlp_b1'], 0.0)
        h = jnp.maximum(dh @ p['mlp_w2'] + p['mlp_b2'], 0.0)

        dec_in = rel_pos @ p['spe_w'] + p['spe_b']
        preds.append(rel_pos)
        last_pos = curr_pos

    return jnp.stack(preds, axis=0), h.reshape(1, batch, H)


# ------------------------------ driver -------------------------------------- #

if __name__ == "__main__":
    SEQ_LEN = 8
    EMB_DIM = 16
    H_DIM = 32
    MLP_DIM = 64
    BOTTLENECK = 32
    BATCH = 6
    seq_start_end = [(0, 3), (3, 6)]   # two sequences of 3 pedestrians each

    key = jax.random.PRNGKey(0)
    kp, kd = jax.random.split(key)
    params = init_params(kp, EMB_DIM, H_DIM, MLP_DIM, BOTTLENECK)

    k1, k2, k3, k4 = jax.random.split(kd, 4)
    last_pos = jax.random.normal(k1, (BATCH, 2), jnp.float32)
    last_pos_rel = jax.random.normal(k2, (BATCH, 2), jnp.float32)
    h0 = jax.random.normal(k3, (1, BATCH, H_DIM), jnp.float32)
    c0 = jax.random.normal(k4, (1, BATCH, H_DIM), jnp.float32)

    pred_traj, final_h = decoder_forward(
        params, last_pos, last_pos_rel, h0, c0, seq_start_end,
        seq_len=SEQ_LEN, h_dim=H_DIM)
    jax.block_until_ready((pred_traj, final_h))

    ref_pred, ref_h = reference_forward(
        params, last_pos, last_pos_rel, h0, c0, seq_start_end,
        seq_len=SEQ_LEN, h_dim=H_DIM)

    assert pred_traj.shape == (SEQ_LEN, BATCH, 2)
    assert final_h.shape == (1, BATCH, H_DIM)
    assert jnp.all(jnp.isfinite(pred_traj)) and jnp.all(jnp.isfinite(final_h))
    assert bool(jnp.allclose(pred_traj, ref_pred, rtol=2e-3, atol=2e-3))
    assert bool(jnp.allclose(final_h, ref_h, rtol=2e-3, atol=2e-3))
    print("KERNEL_OK")
</pallas_src>

<mosaic_0001>
module attributes {stable_mosaic.version = 11 : i64} {
  func.func @decoder_fused_kernel(%arg0: memref<96x128xf32, #tpu.memory_space<vmem>>, %arg1: memref<256x128xf32, #tpu.memory_space<vmem>>, %arg2: memref<16x128xf32, #tpu.memory_space<vmem>>, %arg3: memref<8x8x2xf32, #tpu.memory_space<vmem>>, %arg4: memref<8x32xf32, #tpu.memory_space<vmem>>) attributes {dimension_semantics = [], scalar_prefetch = 0 : i64, scratch_operands = 0 : i64, tpu.core_type = #tpu.core_type<tc>} {
    %c0 = arith.constant 0 : index
    %c0_0 = arith.constant 0 : index
    %0 = vector.load %arg1[%c0, %c0_0] : memref<256x128xf32, #tpu.memory_space<vmem>>, vector<32x128xf32>
    %c32 = arith.constant 32 : index
    %c0_1 = arith.constant 0 : index
    %1 = vector.load %arg1[%c32, %c0_1] : memref<256x128xf32, #tpu.memory_space<vmem>>, vector<32x2xf32>
    %c64 = arith.constant 64 : index
    %c0_2 = arith.constant 0 : index
    %2 = vector.load %arg1[%c64, %c0_2] : memref<256x128xf32, #tpu.memory_space<vmem>>, vector<32x32xf32>
    %c96 = arith.constant 96 : index
    %c0_3 = arith.constant 0 : index
    %3 = vector.load %arg1[%c96, %c0_3] : memref<256x128xf32, #tpu.memory_space<vmem>>, vector<32x32xf32>
    %c128 = arith.constant 128 : index
    %c0_4 = arith.constant 0 : index
    %4 = vector.load %arg1[%c128, %c0_4] : memref<256x128xf32, #tpu.memory_space<vmem>>, vector<32x64xf32>
    %c160 = arith.constant 160 : index
    %c0_5 = arith.constant 0 : index
    %5 = vector.load %arg1[%c160, %c0_5] : memref<256x128xf32, #tpu.memory_space<vmem>>, vector<32x64xf32>
    %c192 = arith.constant 192 : index
    %c0_6 = arith.constant 0 : index
    %6 = vector.load %arg1[%c192, %c0_6] : memref<256x128xf32, #tpu.memory_space<vmem>>, vector<64x32xf32>
    %c0_7 = arith.constant 0 : index
    %c0_8 = arith.constant 0 : index
    %7 = vector.load %arg2[%c0_7, %c0_8] : memref<16x128xf32, #tpu.memory_space<vmem>>, vector<16x128xf32>
    %8 = vector.extract_strided_slice %7 {offsets = [0, 0], sizes = [1, 128], strides = [1, 1]} : vector<16x128xf32> to vector<1x128xf32>
    %9 = vector.extract_strided_slice %7 {offsets = [1, 0], sizes = [1, 128], strides = [1, 1]} : vector<16x128xf32> to vector<1x128xf32>
    %10 = vector.extract_strided_slice %7 {offsets = [2, 0], sizes = [1, 128], strides = [1, 1]} : vector<16x128xf32> to vector<1x128xf32>
    %11 = vector.extract_strided_slice %7 {offsets = [3, 0], sizes = [1, 2], strides = [1, 1]} : vector<16x128xf32> to vector<1x2xf32>
    %12 = vector.extract_strided_slice %7 {offsets = [4, 0], sizes = [1, 32], strides = [1, 1]} : vector<16x128xf32> to vector<1x32xf32>
    %13 = vector.extract_strided_slice %7 {offsets = [5, 0], sizes = [1, 32], strides = [1, 1]} : vector<16x128xf32> to vector<1x32xf32>
    %14 = vector.extract_strided_slice %7 {offsets = [6, 0], sizes = [1, 32], strides = [1, 1]} : vector<16x128xf32> to vector<1x32xf32>
    %15 = vector.extract_strided_slice %7 {offsets = [7, 0], sizes = [1, 32], strides = [1, 1]} : vector<16x128xf32> to vector<1x32xf32>
    %16 = vector.extract_strided_slice %7 {offsets = [8, 0], sizes = [1, 64], strides = [1, 1]} : vector<16x128xf32> to vector<1x64xf32>
    %17 = vector.extract_strided_slice %7 {offsets = [9, 0], sizes = [1, 32], strides = [1, 1]} : vector<16x128xf32> to vector<1x32xf32>
    %c0_9 = arith.constant 0 : index
    %c0_10 = arith.constant 0 : index
    %18 = vector.load %arg0[%c0_9, %c0_10] : memref<96x128xf32, #tpu.memory_space<vmem>>, vector<8x2xf32>
    %c8 = arith.constant 8 : index
    %c0_11 = arith.constant 0 : index
    %19 = vector.load %arg0[%c8, %c0_11] : memref<96x128xf32, #tpu.memory_space<vmem>>, vector<8x2xf32>
    %c16 = arith.constant 16 : index
    %c0_12 = arith.constant 0 : index
    %20 = vector.load %arg0[%c16, %c0_12] : memref<96x128xf32, #tpu.memory_space<vmem>>, vector<8x32xf32>
    %c24 = arith.constant 24 : index
    %c0_13 = arith.constant 0 : index
    %21 = vector.load %arg0[%c24, %c0_13] : memref<96x128xf32, #tpu.memory_space<vmem>>, vector<8x32xf32>
    %c32_14 = arith.constant 32 : index
    %c0_15 = arith.constant 0 : index
    %22 = vector.load %arg0[%c32_14, %c0_15] : memref<96x128xf32, #tpu.memory_space<vmem>>, vector<64x1xf32>
    %23 = tpu.iota {dimensions = array<i32: 1>} : vector<8x128xi32>
    %c64_i32 = arith.constant 64 : i32
    %24 = vector.broadcast %c64_i32 : i32 to vector<8x128xi32>
    %25 = arith.cmpi sge, %23, %24 : vector<8x128xi32>
    %c96_i32 = arith.constant 96 : i32
    %26 = vector.broadcast %c96_i32 : i32 to vector<8x128xi32>
    %27 = arith.cmpi slt, %23, %26 : vector<8x128xi32>
    %28 = arith.andi %25, %27 : vector<8x128xi1>
    %c0_i32 = arith.constant 0 : i32
    %c8_i32 = arith.constant 8 : i32
    %29 = arith.addi %c0_i32, %c8_i32 : i32
    %c1_i32 = arith.constant 1 : i32
    %30:4 = scf.for %arg5 = %c0_i32 to %29 step %c1_i32 iter_args(%arg6 = %20, %arg7 = %21, %arg8 = %18, %arg9 = %19) -> (vector<8x32xf32>, vector<8x32xf32>, vector<8x2xf32>, vector<8x2xf32>)  : i32 {
      %32 = vector.extract_strided_slice %arg9 {offsets = [0, 0], sizes = [8, 1], strides = [1, 1]} : vector<8x2xf32> to vector<8x1xf32>
      %33 = vector.broadcast %32 : vector<8x1xf32> to vector<8x128xf32>
      %34 = vector.broadcast %8 : vector<1x128xf32> to vector<8x128xf32>
      %35 = arith.mulf %33, %34 : vector<8x128xf32>
      %36 = vector.extract_strided_slice %arg9 {offsets = [0, 1], sizes = [8, 1], strides = [1, 1]} : vector<8x2xf32> to vector<8x1xf32>
      %37 = vector.broadcast %36 : vector<8x1xf32> to vector<8x128xf32>
      %38 = vector.broadcast %9 : vector<1x128xf32> to vector<8x128xf32>
      %39 = arith.mulf %37, %38 : vector<8x128xf32>
      %40 = arith.addf %35, %39 : vector<8x128xf32>
      %cst = arith.constant dense<0.000000e+00> : vector<8x128xf32>
      %41 = tpu.matmul %arg6, %0, %cst {dimension_numbers = #tpu.dot_dimension_numbers<[1], [0], [0], [1], [0, 0, 1, 1], [], []>} : vector<8x32xf32>, vector<32x128xf32>, vector<8x128xf32> -> vector<8x128xf32>
      %42 = arith.addf %40, %41 : vector<8x128xf32>
      %43 = vector.broadcast %10 : vector<1x128xf32> to vector<8x128xf32>
      %44 = arith.addf %42, %43 : vector<8x128xf32>
      %45 = arith.negf %44 : vector<8x128xf32>
      %46 = math.exp %45 : vector<8x128xf32>
      %cst_19 = arith.constant 1.000000e+00 : f32
      %47 = vector.broadcast %cst_19 : f32 to vector<8x128xf32>
      %48 = arith.addf %47, %46 : vector<8x128xf32>
      %49 = arith.divf %47, %48 : vector<8x128xf32>
      %cst_20 = arith.constant 2.000000e+00 : f32
      %50 = vector.broadcast %cst_20 : f32 to vector<8x128xf32>
      %51 = arith.mulf %50, %49 : vector<8x128xf32>
      %cst_21 = arith.constant 1.000000e+00 : f32
      %52 = vector.broadcast %cst_21 : f32 to vector<8x128xf32>
      %53 = arith.subf %51, %52 : vector<8x128xf32>
      %54 = arith.select %28, %53, %49 : vector<8x128xi1>, vector<8x128xf32>
      %55 = vector.extract_strided_slice %54 {offsets = [0, 0], sizes = [8, 32], strides = [1, 1]} : vector<8x128xf32> to vector<8x32xf32>
      %56 = vector.extract_strided_slice %54 {offsets = [0, 32], sizes = [8, 32], strides = [1, 1]} : vector<8x128xf32> to vector<8x32xf32>
      %57 = vector.extract_strided_slice %54 {offsets = [0, 64], sizes = [8, 32], strides = [1, 1]} : vector<8x128xf32> to vector<8x32xf32>
      %58 = vector.extract_strided_slice %54 {offsets = [0, 96], sizes = [8, 32], strides = [1, 1]} : vector<8x128xf32> to vector<8x32xf32>
      %59 = arith.mulf %56, %arg7 : vector<8x32xf32>
      %60 = arith.mulf %55, %57 : vector<8x32xf32>
      %61 = arith.addf %59, %60 : vector<8x32xf32>
      %62 = math.tanh %61 : vector<8x32xf32>
      %63 = arith.mulf %58, %62 : vector<8x32xf32>
      %cst_22 = arith.constant dense<0.000000e+00> : vector<8x2xf32>
      %64 = tpu.matmul %63, %1, %cst_22 {dimension_numbers = #tpu.dot_dimension_numbers<[1], [0], [0], [1], [0, 0, 1, 1], [], []>} : vector<8x32xf32>, vector<32x2xf32>, vector<8x2xf32> -> vector<8x2xf32>
      %65 = vector.broadcast %11 : vector<1x2xf32> to vector<8x2xf32>
      %66 = arith.addf %64, %65 : vector<8x2xf32>
      %67 = arith.addf %66, %arg8 : vector<8x2xf32>
      %68 = vector.extract_strided_slice %67 {offsets = [0, 0], sizes = [8, 1], strides = [1, 1]} : vector<8x2xf32> to vector<8x1xf32>
      %69 = vector.broadcast %68 : vector<8x1xf32> to vector<8x32xf32>
      %70 = vector.broadcast %12 : vector<1x32xf32> to vector<8x32xf32>
      %71 = arith.mulf %69, %70 : vector<8x32xf32>
      %72 = vector.extract_strided_slice %67 {offsets = [0, 1], sizes = [8, 1], strides = [1, 1]} : vector<8x2xf32> to vector<8x1xf32>
      %73 = vector.broadcast %72 : vector<8x1xf32> to vector<8x32xf32>
      %74 = vector.broadcast %13 : vector<1x32xf32> to vector<8x32xf32>
      %75 = arith.mulf %73, %74 : vector<8x32xf32>
      %76 = arith.addf %71, %75 : vector<8x32xf32>
      %cst_23 = arith.constant dense<0.000000e+00> : vector<8x32xf32>
      %77 = tpu.matmul %63, %2, %cst_23 {dimension_numbers = #tpu.dot_dimension_numbers<[1], [0], [0], [1], [0, 0, 1, 1], [], []>} : vector<8x32xf32>, vector<32x32xf32>, vector<8x32xf32> -> vector<8x32xf32>
      %78 = arith.addf %76, %77 : vector<8x32xf32>
      %79 = vector.broadcast %14 : vector<1x32xf32> to vector<8x32xf32>
      %80 = arith.addf %78, %79 : vector<8x32xf32>
      %81 = vector.extract_strided_slice %80 {offsets = [0, 0], sizes = [1, 32], strides = [1, 1]} : vector<8x32xf32> to vector<1x32xf32>
      %82 = vector.broadcast %81 : vector<1x32xf32> to vector<8x32xf32>
      %83 = arith.subf %82, %76 : vector<8x32xf32>
      %84 = vector.extract_strided_slice %80 {offsets = [1, 0], sizes = [1, 32], strides = [1, 1]} : vector<8x32xf32> to vector<1x32xf32>
      %85 = vector.broadcast %84 : vector<1x32xf32> to vector<8x32xf32>
      %86 = arith.subf %85, %76 : vector<8x32xf32>
      %87 = vector.extract_strided_slice %80 {offsets = [2, 0], sizes = [1, 32], strides = [1, 1]} : vector<8x32xf32> to vector<1x32xf32>
      %88 = vector.broadcast %87 : vector<1x32xf32> to vector<8x32xf32>
      %89 = arith.subf %88, %76 : vector<8x32xf32>
      %90 = vector.extract_strided_slice %80 {offsets = [3, 0], sizes = [1, 32], strides = [1, 1]} : vector<8x32xf32> to vector<1x32xf32>
      %91 = vector.broadcast %90 : vector<1x32xf32> to vector<8x32xf32>
      %92 = arith.subf %91, %76 : vector<8x32xf32>
      %93 = vector.extract_strided_slice %80 {offsets = [4, 0], sizes = [1, 32], strides = [1, 1]} : vector<8x32xf32> to vector<1x32xf32>
      %94 = vector.broadcast %93 : vector<1x32xf32> to vector<8x32xf32>
      %95 = arith.subf %94, %76 : vector<8x32xf32>
      %96 = vector.extract_strided_slice %80 {offsets = [5, 0], sizes = [1, 32], strides = [1, 1]} : vector<8x32xf32> to vector<1x32xf32>
      %97 = vector.broadcast %96 : vector<1x32xf32> to vector<8x32xf32>
      %98 = arith.subf %97, %76 : vector<8x32xf32>
      %99 = vector.extract_strided_slice %80 {offsets = [6, 0], sizes = [1, 32], strides = [1, 1]} : vector<8x32xf32> to vector<1x32xf32>
      %100 = vector.broadcast %99 : vector<1x32xf32> to vector<8x32xf32>
      %101 = arith.subf %100, %76 : vector<8x32xf32>
      %102 = vector.extract_strided_slice %80 {offsets = [7, 0], sizes = [1, 32], strides = [1, 1]} : vector<8x32xf32> to vector<1x32xf32>
      %103 = vector.broadcast %102 : vector<1x32xf32> to vector<8x32xf32>
      %104 = arith.subf %103, %76 : vector<8x32xf32>
      %105 = tpu.concatenate %83, %86, %89, %92, %95, %98, %101, %104 in 0 : vector<8x32xf32>, vector<8x32xf32>, vector<8x32xf32>, vector<8x32xf32>, vector<8x32xf32>, vector<8x32xf32>, vector<8x32xf32>, vector<8x32xf32> -> vector<64x32xf32>
      %cst_24 = arith.constant 0.000000e+00 : f32
      %106 = vector.broadcast %cst_24 : f32 to vector<64x32xf32>
      %107 = arith.maximumf %105, %106 : vector<64x32xf32>
      %cst_25 = arith.constant dense<0.000000e+00> : vector<64x32xf32>
      %108 = tpu.matmul %107, %3, %cst_25 {dimension_numbers = #tpu.dot_dimension_numbers<[1], [0], [0], [1], [0, 0, 1, 1], [], []>} : vector<64x32xf32>, vector<32x32xf32>, vector<64x32xf32> -> vector<64x32xf32>
      %109 = vector.broadcast %15 : vector<1x32xf32> to vector<64x32xf32>
      %110 = arith.addf %108, %109 : vector<64x32xf32>
      %cst_26 = arith.constant 0.000000e+00 : f32
      %111 = vector.broadcast %cst_26 : f32 to vector<64x32xf32>
      %112 = arith.maximumf %110, %111 : vector<64x32xf32>
      %113 = vector.broadcast %22 : vector<64x1xf32> to vector<64x32xf32>
      %114 = arith.mulf %112, %113 : vector<64x32xf32>
      %115 = vector.extract_strided_slice %114 {offsets = [0, 0], sizes = [8, 32], strides = [1, 1]} : vector<64x32xf32> to vector<8x32xf32>
      %116 = vector.extract_strided_slice %114 {offsets = [8, 0], sizes = [8, 32], strides = [1, 1]} : vector<64x32xf32> to vector<8x32xf32>
      %117 = arith.maximumf %115, %116 : vector<8x32xf32>
      %118 = vector.extract_strided_slice %114 {offsets = [16, 0], sizes = [8, 32], strides = [1, 1]} : vector<64x32xf32> to vector<8x32xf32>
      %119 = arith.maximumf %117, %118 : vector<8x32xf32>
      %120 = vector.extract_strided_slice %114 {offsets = [24, 0], sizes = [8, 32], strides = [1, 1]} : vector<64x32xf32> to vector<8x32xf32>
      %121 = arith.maximumf %119, %120 : vector<8x32xf32>
      %122 = vector.extract_strided_slice %114 {offsets = [32, 0], sizes = [8, 32], strides = [1, 1]} : vector<64x32xf32> to vector<8x32xf32>
      %123 = arith.maximumf %121, %122 : vector<8x32xf32>
      %124 = vector.extract_strided_slice %114 {offsets = [40, 0], sizes = [8, 32], strides = [1, 1]} : vector<64x32xf32> to vector<8x32xf32>
      %125 = arith.maximumf %123, %124 : vector<8x32xf32>
      %126 = vector.extract_strided_slice %114 {offsets = [48, 0], sizes = [8, 32], strides = [1, 1]} : vector<64x32xf32> to vector<8x32xf32>
      %127 = arith.maximumf %125, %126 : vector<8x32xf32>
      %128 = vector.extract_strided_slice %114 {offsets = [56, 0], sizes = [8, 32], strides = [1, 1]} : vector<64x32xf32> to vector<8x32xf32>
      %129 = arith.maximumf %127, %128 : vector<8x32xf32>
      %cst_27 = arith.constant dense<0.000000e+00> : vector<8x64xf32>
      %130 = tpu.matmul %63, %4, %cst_27 {dimension_numbers = #tpu.dot_dimension_numbers<[1], [0], [0], [1], [0, 0, 1, 1], [], []>} : vector<8x32xf32>, vector<32x64xf32>, vector<8x64xf32> -> vector<8x64xf32>
      %cst_28 = arith.constant dense<0.000000e+00> : vector<8x64xf32>
      %131 = tpu.matmul %129, %5, %cst_28 {dimension_numbers = #tpu.dot_dimension_numbers<[1], [0], [0], [1], [0, 0, 1, 1], [], []>} : vector<8x32xf32>, vector<32x64xf32>, vector<8x64xf32> -> vector<8x64xf32>
      %132 = arith.addf %130, %131 : vector<8x64xf32>
      %133 = vector.broadcast %16 : vector<1x64xf32> to vector<8x64xf32>
      %134 = arith.addf %132, %133 : vector<8x64xf32>
      %cst_29 = arith.constant 0.000000e+00 : f32
      %135 = vector.broadcast %cst_29 : f32 to vector<8x64xf32>
      %136 = arith.maximumf %134, %135 : vector<8x64xf32>
      %cst_30 = arith.constant dense<0.000000e+00> : vector<8x32xf32>
      %137 = tpu.matmul %136, %6, %cst_30 {dimension_numbers = #tpu.dot_dimension_numbers<[1], [0], [0], [1], [0, 0, 1, 1], [], []>} : vector<8x64xf32>, vector<64x32xf32>, vector<8x32xf32> -> vector<8x32xf32>
      %138 = vector.broadcast %17 : vector<1x32xf32> to vector<8x32xf32>
      %139 = arith.addf %137, %138 : vector<8x32xf32>
      %cst_31 = arith.constant 0.000000e+00 : f32
      %140 = vector.broadcast %cst_31 : f32 to vector<8x32xf32>
      %141 = arith.maximumf %139, %140 : vector<8x32xf32>
      %142 = arith.index_cast %arg5 : i32 to index
      %c0_32 = arith.constant 0 : index
      %c0_33 = arith.constant 0 : index
      %143 = vector.load %arg3[%142, %c0_32, %c0_33] : memref<8x8x2xf32, #tpu.memory_space<vmem>>, vector<1x8x2xf32>
      %144 = vector.shape_cast %143 : vector<1x8x2xf32> to vector<8x2xf32>
      %145 = vector.shape_cast %66 : vector<8x2xf32> to vector<1x8x2xf32>
      tpu.vector_store %arg3[%142, %c0_32, %c0_33], %145 {strides = array<i32>} : memref<8x8x2xf32, #tpu.memory_space<vmem>>, vector<1x8x2xf32>,
      scf.yield %141, %61, %67, %66 : vector<8x32xf32>, vector<8x32xf32>, vector<8x2xf32>, vector<8x2xf32>
    }
    %c8_i32_16 = arith.constant 8 : i32
    %c0_17 = arith.constant 0 : index
    %c0_18 = arith.constant 0 : index
    %31 = vector.load %arg4[%c0_17, %c0_18] : memref<8x32xf32, #tpu.memory_space<vmem>>, vector<8x32xf32>
    tpu.vector_store %arg4[%c0_17, %c0_18], %30#0 {strides = array<i32>} : memref<8x32xf32, #tpu.memory_space<vmem>>, vector<8x32xf32>,
    return
  }
}

</mosaic_0001>

<bundles_post_ra>
// kernel: tpu_custom_call.1
= control target key start
LH: loop header
LB: loop body
LE: loop exit
PB: predicated region body
PF: predicated region fallthrough
CT: control target
= control target key end

     0   :  { %10 = vsyncpa [#allocation3], 0  ;;  %s1057_s0 = inlined_call_operand.hbm [shape: f32[96,128], index: 0, kind: input, shape index: {}]   ;;  %s1058_s1 = inlined_call_operand.hbm [shape: f32[256,128], index: 1, kind: input, shape index: {}]   ;;  %s1059_s2 = inlined_call_operand.hbm [shape: f32[16,128], index: 2, kind: input, shape index: {}]   ;;  %s1060_s3 = inlined_call_operand.vmem [shape: f32[8,8,2], index: 3, kind: output, shape index: {0}]   ;;  %s1061_s4 = inlined_call_operand.hbm [shape: f32[8,32], index: 4, kind: output, shape index: {1}]  }
   0x1   :  { %11 = vsyncpa [#allocation6], 0 }
   0x2   :  { %12 = vsyncpa [#allocation4], 0  ;;  %s30_s17 = sshll.u32 %s1058_s1, 4  ;;  %s778_s18 = smov [#allocation5]   ;;  %s31_s17 = int_to_ptr.hbm [resolvable:$true] %s30_s17 }
   0x3   :  { %s32_s19 = sshll.u32 %s778_s18, 4  ;;  %s17_s22 = sshll.u32 %s1057_s0, 4  ;;  %s33_s19 = int_to_ptr.vmem [resolvable:$true] %s32_s19  ;;  %s18_s22 = int_to_ptr.hbm [resolvable:$true] %s17_s22 }
   0x4   :  { %s779_s23 = smov 128   ;;  %s780_s24 = smov 8  }
   0x5   :  { %38 = dma.hbm_to_vmem [thread:$0]  %s31_s17, 4096, %s33_s19, [#allocation6], %s779_s23, %s779_s23, %s780_s24  }
   0x6   :  { %s781_s25 = smov [#allocation2]   ;;  %s43_s29 = sshll.u32 %s1059_s2, 4  ;;  %s44_s29 = int_to_ptr.hbm [resolvable:$true] %s43_s29 }
   0x7   :  { %s19_s26 = sshll.u32 %s781_s25, 4  ;;  %s782_s1 = smov [#allocation7]   ;;  %s20_s26 = int_to_ptr.vmem [resolvable:$true] %s19_s26 }
   0x8   :  { %25 = dma.hbm_to_vmem [thread:$0]  %s18_s22, 1536, %s20_s26, [#allocation3], %s779_s23, %s779_s23, %s780_s24  }
   0x9   :  { %s45_s30 = sshll.u32 %s782_s1, 4  ;;  %s46_s30 = int_to_ptr.vmem [resolvable:$true] %s45_s30 }
   0xa   :  { %51 = dma.hbm_to_vmem [thread:$0]  %s44_s29, 256, %s46_s30, [#allocation6], %s779_s23, %s779_s23, %s780_s24  }
   0xb   :  { %752 = dma.done.wait [#allocation3], 1536  }
   0xc   :  { %753 = vsyncadd [#allocation3], 4294965760 }
   0xd   :  { %754 = dma.done.wait [#allocation6], 4352  }
   0xe   :  { %755 = vsyncadd [#allocation6], 4294962944  ;;  %v110_v0 = vlaneseq  ;;  %v1064_v2 = vmov 0  ;;  %v827_v3 = vld [vmem:[#allocation5] sm:$0xff]  ;;  %v829_v4 = vld [vmem:[#allocation5 + $0x8] sm:$0xff]  ;;  %s919_s0 = smov 0  }
   0xf   :  { %1067 = vst [vmem:[#allocation13_spill] sm:$0xff] %v827_v3  ;;  %v831_v5 = vld [vmem:[#allocation5 + $0x10] sm:$0xff]  ;;  %v833_v6 = vld [vmem:[#allocation5 + $0x18] sm:$0xff]  ;;  %v835_v7 = vld [vmem:[#allocation5 + $0x20] sm:$0xff] }
  0x10   :  { %v111_v1 = vand.u32 127, %v110_v0  ;;  %1068 = vst [vmem:[#allocation14_spill] sm:$0xff] %v829_v4  ;;  %v837_v8 = vld [vmem:[#allocation5 + $0x28] sm:$0xff]  ;;  %v839_v9 = vld [vmem:[#allocation5 + $0x30] sm:$0xff]  ;;  %v841_v10 = vld [vmem:[#allocation5 + $0x38] sm:$0xff] }
  0x11   :  { %1069 = vst [vmem:[#allocation15_spill] sm:$0xff] %v831_v5  ;;  %v843_v11 = vld [vmem:[#allocation5 + $0x40] sm:$0xff]  ;;  %v845_v12 = vld [vmem:[#allocation5 + $0x48] sm:$0xff]  ;;  %v847_v13 = vld [vmem:[#allocation5 + $0x50] sm:$0xff] }
  0x12   :  { %vm112_vm0 = vcmp.ge.s32.totalorder %v111_v1, 64  ;;  %vm113_vm1 = vcmp.lt.s32.totalorder %v111_v1, 96  ;;  %1070 = vst [vmem:[#allocation16_spill] sm:$0xff] %v833_v6  ;;  %v849_v14 = vld [vmem:[#allocation5 + $0x58] sm:$0xff]  ;;  %v851_v15 = vld [vmem:[#allocation5 + $0x60] sm:$0xff]  ;;  %v853_v16 = vld [vmem:[#allocation5 + $0x68] sm:$0xff] }
  0x13   :  { %vm823_vm2 = vmand %vm112_vm0, %vm113_vm1  ;;  %1071 = vst [vmem:[#allocation17_spill] sm:$0xff] %v835_v7  ;;  %v855_v17 = vld [vmem:[#allocation5 + $0x70] sm:$0xff]  ;;  %v857_v18 = vld [vmem:[#allocation5 + $0x78] sm:$0xff] }
  0x14   :  { %v1065_v2 = vsel %vm823_vm2, 4294967295, %v1064_v2  ;;  %1072 = vst [vmem:[#allocation18_spill] sm:$0xff] %v837_v8  ;;  %v859_v19 = vld [vmem:[#allocation5 + $0x80] sm:$0xff]  ;;  %v861_v20 = vld [vmem:[#allocation5 + $0x88] sm:$0xff]  ;;  %v863_v21 = vld [vmem:[#allocation5 + $0x90] sm:$0xff] }
  0x15   :  { %1066 = vst [vmem:[#allocation12_spill] sm:$0xff] %v1065_v2  ;;  %v865_v22 = vld [vmem:[#allocation5 + $0x98] sm:$0xff]  ;;  %v867_v23 = vld [vmem:[#allocation5 + $0xa0] sm:$0xff]  ;;  %v869_v24 = vld [vmem:[#allocation5 + $0xa8] sm:$0xff] }
  0x16   :  { %1073 = vst [vmem:[#allocation19_spill] sm:$0xff] %v839_v9  ;;  %v871_v25 = vld [vmem:[#allocation5 + $0xb0] sm:$0xff]  ;;  %v873_v26 = vld [vmem:[#allocation5 + $0xb8] sm:$0xff]  ;;  %v875_v27 = vld [vmem:[#allocation5 + $0xc0] sm:$0xff] }
  0x17   :  { %1074 = vst [vmem:[#allocation20_spill] sm:$0xff] %v841_v10  ;;  %v877_v28 = vld [vmem:[#allocation5 + $0xc8] sm:$0xff]  ;;  %v879_v29 = vld [vmem:[#allocation5 + $0xd0] sm:$0xff]  ;;  %v881_v30 = vld [vmem:[#allocation5 + $0xd8] sm:$0xff] }
  0x18   :  { %1075 = vst [vmem:[#allocation21_spill] sm:$0xff] %v843_v11  ;;  %v883_v31 = vld [vmem:[#allocation5 + $0xe0] sm:$0xff]  ;;  %v885_v32 = vld [vmem:[#allocation5 + $0xe8] sm:$0xff]  ;;  %v887_v33 = vld [vmem:[#allocation5 + $0xf0] sm:$0xff] }
  0x19   :  { %1076 = vst [vmem:[#allocation22_spill] sm:$0xff] %v845_v12  ;;  %v889_v34 = vld [vmem:[#allocation5 + $0xf8] sm:$0xff]  ;;  %v891_v35 = vld [vmem:[#allocation7] sm:$0xff]  ;;  %v893_v36 = vld [vmem:[#allocation7 + $0x8] sm:$0xff] }
  0x1a   :  { %v98_v37 = vld [vmem:[#allocation2] sm:$0xff]   ;;  %v99_v38 = vld [vmem:[#allocation2 + $0x8] sm:$0xff]   ;;  %v100_v39 = vld [vmem:[#allocation2 + $0x10] sm:$0xff]  }
  0x1b   :  { %v101_v40 = vld [vmem:[#allocation2 + $0x18] sm:$0xff]   ;;  %v895_v41 = vld [vmem:[#allocation2 + $0x20] sm:$0xff]  ;;  %v897_v42 = vld [vmem:[#allocation2 + $0x28] sm:$0xff] }
  0x1c   :  { %v899_v43 = vld [vmem:[#allocation2 + $0x30] sm:$0xff]  ;;  %v901_v44 = vld [vmem:[#allocation2 + $0x38] sm:$0xff]  ;;  %v903_v45 = vld [vmem:[#allocation2 + $0x40] sm:$0xff] }
  0x1d   :  { %v905_v46 = vld [vmem:[#allocation2 + $0x48] sm:$0xff]  ;;  %v907_v47 = vld [vmem:[#allocation2 + $0x50] sm:$0xff]  ;;  %v909_v48 = vld [vmem:[#allocation2 + $0x58] sm:$0xff] }
  0x1e LB: > { %v1077_v6 = vld [vmem:[#allocation16_spill] sm:$0xff]  ;;  %v1062_v49 = vmov 0   ;;  %v1079_v5 = vld [vmem:[#allocation15_spill] sm:$0xff]  ;;  %262 = vmatpush.msra.mxu2 %v849_v14  ;;  %v1081_v4 = vld [vmem:[#allocation14_spill] sm:$0xff]  ;;  %vm139_vm3 = vcmask 261120   ;;  %567 = vmatpush.msra.mxu3 %v857_v18  ;;  %v784_v50 = vmov 1   ;;  %s776_s0 = sphi %s919_s0, %s120_s0   ;;  %v772_v39 = vphi %v100_v39, %v1091_v39   ;;  %v768_v40 = vphi %v101_v40, %v1090_v40   ;;  %v764_v37 = vphi %v98_v37, %v1008_v37   ;;  %v760_v38 = vphi %v99_v38, %v1089_v38  }
  0x1f   : > { %155 = vmatpush.msra.mxu0 %v1077_v6  ;;  %v1078_v10 = vld [vmem:[#allocation20_spill] sm:$0xff]  ;;  %625 = vset.pattern.permute.xlu0 %v1062_v49  ;;  %v1080_v9 = vld [vmem:[#allocation19_spill] sm:$0xff]  ;;  %v1082_v8 = vld [vmem:[#allocation18_spill] sm:$0xff]  ;;  %v136_v52 = vperm.slane %v891_v35, 1  ;;  %v130_v53 = vperm.slane %v891_v35, 0  ;;  %v164_v58 = vperm.slane %v891_v35, 2 }
  0x20   : > { %227 = vmatpush.msra.mxu1 %v1078_v10  ;;  %628 = vset.pattern.permute.xlu1 %v1062_v49  ;;  %v1083_v3 = vld [vmem:[#allocation13_spill] sm:$0xff]  ;;  %v1084_v12 = vld [vmem:[#allocation22_spill] sm:$0xff]  ;;  %s785_s2 = smov 64   ;;  %s786_s5 = smov 32   ;;  %vm500_vm8 = vcmask 15360   ;;  %vm473_vm9 = vcmask 523264  }
  0x21   : > { %156 = vmatpush.msra.mxu0 %v1079_v5  ;;  %127 = vperm.xlu0 %625, %v760_v38   ;;  %v1085_v7 = vld [vmem:[#allocation17_spill] sm:$0xff]  ;;  %s787_s6 = smov 96   ;;  %s565_s7 = sshll.u32 %s776_s0, 3 }
  0x22   : > { %228 = vmatpush.msra.mxu1 %v1080_v9  ;;  %627 = vset.pattern.permute.xlu2 %v1062_v49  ;;  %v1086_v11 = vld [vmem:[#allocation21_spill] sm:$0xff]  ;;  %s499_s10 = scalar_lea.vmem %s1060_s3, %s565_s7  ;;  %s120_s0 = sadd.s32 1, %s776_s0  }
  0x23   : > { %157 = vmatpush.msra.mxu0 %v1081_v4  ;;  %263 = vmatpush.msra.mxu2 %v847_v13  ;;  %p117_p0 = scmp.ge.s32.totalorder %s120_s0, 8  }
  0x24   : > { %229 = vmatpush.msra.mxu1 %v1082_v8  ;;  %569 = vmatpush.msra.mxu3 %v855_v17  ;;  %s517_s13 = sshll.u32 (%p117_p0), %s1061_s4, 4  ;;  %s788_s14 = smov (%p117_p0), [#allocation8]   ;;  %s518_s13 = int_to_ptr.hbm [resolvable:$true] %s517_s13 }
  0x25   : > { %158 = vmatpush.msra.mxu0 %v1083_v3  ;;  %264 = vmatpush.msra.mxu2 %v1084_v12  ;;  %s515_s15 = sshll.u32 (%p117_p0), %s788_s14, 4  ;;  %s516_s15 = int_to_ptr.vmem [resolvable:$true] %s515_s15 }
  0x26   : > { %549 = vmatmul.msk.f32.vlgmr.msra.gmra.mxu0 %vm139_vm3, %v772_v39  ;;  %230 = vmatpush.msra.mxu1 %v1085_v7 }
  0x27   : > { %334 = vmatpush.msrb.mxu0 %v857_v18  ;;  %265 = vmatpush.msra.mxu2 %v1086_v11 }
  0x28   : > { %566 = vmatpush.msrb.mxu1 %v857_v18  ;;  %571 = vmatpush.msra.mxu3 %v853_v16 }
  0x29   : > { %626 = vset.pattern.permute.xlu0 %v784_v50  ;;  %335 = vmatpush.msrb.mxu0 %v855_v17 }
  0x2a   : > { %133 = vperm.xlu0 %626, %v760_v38   ;;  %568 = vmatpush.msrb.mxu1 %v855_v17 }
  0x2b   : > { %336 = vmatpush.msrb.mxu0 %v853_v16  ;;  %485 = vmatpush.msrb.mxu2 %v889_v34 }
  0x2c   : > { %570 = vmatpush.msrb.mxu1 %v853_v16  ;;  %573 = vmatpush.msra.mxu3 %v851_v15 }
  0x2d   : > { %337 = vmatpush.msrb.mxu0 %v851_v15  ;;  %486 = vmatpush.msrb.mxu2 %v887_v33 }
  0x2e   : > { %572 = vmatpush.msrb.mxu1 %v851_v15 }
  0x2f   : > { %441 = vmatpush.msra.mxu0 %v873_v26  ;;  %487 = vmatpush.msrb.mxu2 %v885_v32 }
  0x31   : > { %442 = vmatpush.msra.mxu0 %v871_v25  ;;  %488 = vmatpush.msrb.mxu2 %v883_v31 }
  0x33   : > { %443 = vmatpush.msra.mxu0 %v869_v24  ;;  %489 = vmatpush.msrb.mxu2 %v881_v30 }
  0x35   : > { %444 = vmatpush.msra.mxu0 %v867_v23  ;;  %490 = vmatpush.msrb.mxu2 %v879_v29 }
  0x37   : > { %491 = vmatpush.msrb.mxu2 %v877_v28 }
  0x39   : > { %492 = vmatpush.msrb.mxu2 %v875_v27 }
  0x93   : > { %v128_v51 = vpop.permute.xlu0 %127 }
  0x94   : > { %v131_v56 = vmul.f32 %v130_v53, %v128_v51 }
  0x9c   : > { %v134_v54 = vpop.permute.xlu0 %133 }
  0x9d   : > { %v137_v55 = vmul.f32 %v136_v52, %v134_v54 }
  0x9f   : > { %v138_v57 = vadd.f32 %v137_v55, %v131_v56 }
  0xa3   : > { %v160_v59 = vpop.f32.mrf.mxu0 }
  0xa4   : > { %v163_v60 = vadd.f32 %v160_v59, %v138_v57 }
  0xa6   : > { %v165_v61 = vadd.f32 %v164_v58, %v163_v60 }
  0xa8   : > { %v550_v62 = vmul.f32 -1.442695, %v165_v61 }
  0xaa   : > { %630 = vpow2.f32 %v550_v62 }
  0xb0   : > { %v631_v63 = vpop.eup %630 }
  0xb1   : > { %v169_v0 = vadd.f32 1.0, %v631_v63 }
  0xb3   : > { %632 = vrcp.f32 %v169_v0  ;;  %v181_v50 = vand.u32 2147483648, %v169_v0  ;;  %v179_v3 = vand.u32 2147483647, %v169_v0  ;;  %vm175_vm5 = vweird.f32 %v169_v0 }
  0xb5   : > { %v182_v51 = vor.u32 1.1754944e-38, %v181_v50  ;;  %vm180_vm7 = vcmp.eq.f32.partialorder %v179_v3, 8.507059e+37 }
  0xb9   : > { %v633_v1 = vpop.eup %632 }
  0xba   : > { %v171_v38 = vmul.f32 %v633_v1, %v169_v0  ;;  %vm176_vm4 = vweird.f32 %v633_v1 }
  0xbb   : > { %vm177_vm6 = vmor %vm175_vm5, %vm176_vm4 }
  0xbc   : > { %v172_v39 = vsub.f32 1.0, %v171_v38 }
  0xbe   : > { %v173_v49 = vmul.f32 %v633_v1, %v172_v39 }
  0xc0   : > { %v174_v52 = vadd.f32 %v633_v1, %v173_v49 }
  0xc2   : > { %v178_v53 = vsel %vm177_vm6, %v633_v1, %v174_v52  ;;  %v209_v52 = vperm.slane %v891_v35, 3 }
  0xc3   : > { %v183_v54 = vsel %vm180_vm7, %v182_v51, %v178_v53 }
  0xc4   : > { %v185_v55 = vmul.f32 2.0, %v183_v54 }
  0xc6   : > { %v551_v56 = vadd.f32 -1.0, %v185_v55  ;;  %v241_v55 = vperm.slane %v891_v35, 4 }
  0xc8   : > { %v187_v57 = vsel %vm823_vm2, %v551_v56, %v183_v54  ;;  %v1088_v54 = vmov 0   ;;  %v247_v56 = vperm.slane %v891_v35, 5 }
  0xc9   : > { %194 = vrot.lane.b32.xlu1 %v187_v57, %s785_s2 }
  0xd1   : > { %189 = vrot.lane.b32.xlu1 %v768_v40, %s786_s5 }
 0x13b   : > { %v195_v58 = vpop.permute.xlu1 %194 }
 0x13c   : > { %v197_v59 = vmul.f32 %v195_v58, %v187_v57 }
 0x13e   : > { %199 = vrot.lane.b32.xlu2 %v197_v59, %s786_s5 }
 0x143   : > { %v190_v49 = vpop.permute.xlu1 %189 }
 0x144   : > { %v192_v60 = vmul.f32 %v190_v49, %v187_v57 }
 0x198   : > { %v200_v61 = vpop.permute.xlu2 %199 }
 0x199   : > { %v202_v62 = vadd.f32 %v200_v61, %v192_v60  ;;  %v271_v61 = vperm.slane %v891_v35, 6 }
 0x19b   : > { %634 = vtanh.f32 %v202_v62 }
 0x1a1   : > { %v635_v3 = vpop.eup %634 }
 0x1a2   : > { %205 = vrot.lane.b32.xlu2 %v635_v3, %s785_s2 }
 0x1fc   : > { %v206_v63 = vpop.permute.xlu2 %205 }
 0x1fd   : > { %v208_v0 = vmul.f32 %v206_v63, %v187_v57 }
 0x1ff   : > { %211 = vrot.lane.b32.xlu1 %v208_v0, %s786_s5 }
 0x207   : > { %373 = vperm.xlu1 %628, %v895_v41  }
 0x20f   : > { %388 = vperm.xlu1 %628, %v901_v44  }
 0x217   : > { %398 = vperm.xlu1 %628, %v905_v46  }
 0x21f   : > { %503 = vrot.lane.b32.xlu1 %v202_v62, %s787_s6 }
 0x271   : > { %v981_v40 = vpop.permute.xlu1 %211 }
 0x272   : > { %552 = vmatmul.msk.f32.vlgmr.msra.gmra.mxu1 %vm139_vm3, %v981_v40  ;;  %553 = vmatmul.msk.f32.vlgmr.msra.gmra.mxu2 %vm139_vm3, %v981_v40 }
 0x273   : > { %461 = vmatpush.msra.mxu1 %v865_v22 }
 0x275   : > { %462 = vmatpush.msra.mxu1 %v863_v21 }
 0x277   : > { %463 = vmatpush.msra.mxu1 %v861_v20 }
 0x279   : > { %v990_v1 = vpop.permute.xlu1 %373  ;;  %464 = vmatpush.msra.mxu1 %v859_v19 }
 0x281   : > { %v993_v38 = vpop.permute.xlu1 %388 }
 0x289   : > { %v995_v39 = vpop.permute.xlu1 %398 }
 0x291   : > { %v997_v50 = vpop.permute.xlu1 %503  }
 0x2ef   : > { %v232_v51 = vpop.f32.mrf.mxu1 }
 0x2f0   : > { %v1004_v53 = vadd.f32 %v232_v51, %v209_v52  }
 0x2f2   : > { %v1008_v37 = vadd.f32 %v764_v37, %v1004_v53   ;;  %501 = vst.msk [vmem:[%s499_s10] sm:$0xff] %vm500_vm8, %v1004_v53 }
 0x2f4   : > { %244 = vperm.xlu0 %626, %v1008_v37   ;;  %238 = vperm.xlu2 %627, %v1008_v37  }
 0x2f5   : > { %v267_v62 = vpop.f32.mrf.mxu2 }
 0x2fc   : > { %378 = vperm.xlu2 %627, %v897_v42   ;;  %629 = vset.pattern.permute.xlu0 %v1088_v54 }
 0x2fd   : > { %383 = vperm.xlu0 %629, %v899_v43  }
 0x304   : > { %393 = vperm.xlu2 %627, %v903_v45  }
 0x305   : > { %408 = vperm.xlu0 %629, %v909_v48  }
 0x30c   : > { %403 = vperm.xlu2 %627, %v907_v47  }
 0x34e   : > { %v239_v57 = vpop.permute.xlu2 %238 }
 0x34f   : > { %v242_v59 = vmul.f32 %v241_v55, %v239_v57 }
 0x366   : > { %v245_v58 = vpop.permute.xlu0 %244 }
 0x367   : > { %v248_v49 = vmul.f32 %v247_v56, %v245_v58 }
 0x369   : > { %v249_v60 = vadd.f32 %v248_v49, %v242_v59 }
 0x36b   : > { %v270_v3 = vadd.f32 %v267_v62, %v249_v60 }
 0x36d   : > { %v272_v63 = vadd.f32 %v271_v61, %v270_v3 }
 0x36f   : > { %v273_v0 = vperm.slane %v272_v63, 0  ;;  %v277_v52 = vperm.slane %v272_v63, 2  ;;  %v281_v51 = vperm.slane %v272_v63, 4  ;;  %v275_v5 = vperm.slane %v272_v63, 1 }
 0x370   : > { %v279_v9 = vperm.slane %v272_v63, 3  ;;  %v283_v10 = vperm.slane %v272_v63, 5  ;;  %v285_v61 = vperm.slane %v272_v63, 6 }
 0x371   : > { %v274_v54 = vsub.f32 %v273_v0, %v249_v60  ;;  %v278_v2 = vsub.f32 %v277_v52, %v249_v60  ;;  %v282_v4 = vsub.f32 %v281_v51, %v249_v60  ;;  %v276_v55 = vsub.f32 %v275_v5, %v249_v60  ;;  %v379_v51 = vpop.permute.xlu2 %378 }
 0x372   : > { %v280_v56 = vsub.f32 %v279_v9, %v249_v60  ;;  %v284_v57 = vsub.f32 %v283_v10, %v249_v60  ;;  %v297_v10 = vperm.slane %v891_v35, 7 }
 0x373   : > { %v289_v6 = vmax.f32 %v274_v54, 0.0  ;;  %v291_v7 = vmax.f32 %v278_v2, 0.0  ;;  %v293_v8 = vmax.f32 %v282_v4, 0.0  ;;  %v290_v58 = vmax.f32 %v276_v55, 0.0 }
 0x374   : > { %v292_v59 = vmax.f32 %v280_v56, 0.0  ;;  %v294_v49 = vmax.f32 %v284_v57, 0.0  ;;  %v286_v2 = vsub.f32 %v285_v61, %v249_v60 }
 0x375   : > { %554 = vmatmul.msk.f32.vlgmr.msrb.gmra.mxu0 %vm139_vm3, %v289_v6  ;;  %556 = vmatmul.msk.f32.vlgmr.msrb.gmra.mxu1 %vm139_vm3, %v291_v7  ;;  %v287_v6 = vperm.slane %v272_v63, 7 }
 0x376   : > { %558 = vmatmul.msk.f32.vlgmr.msra.gmra.mxu3 %vm139_vm3, %v293_v8  ;;  %v295_v4 = vmax.f32 %v286_v2, 0.0 }
 0x377   : > { %v288_v5 = vsub.f32 %v287_v6, %v249_v60 }
 0x379   : > { %v296_v7 = vmax.f32 %v288_v5, 0.0  ;;  %v394_v5 = vpop.permute.xlu2 %393 }
 0x37d   : > { %555 = vmatmul.msk.f32.gmra.mxu0 %vm139_vm3, %v290_v58  ;;  %557 = vmatmul.msk.f32.gmra.mxu1 %vm139_vm3, %v292_v59 }
 0x37e   : > { %559 = vmatmul.msk.f32.gmra.mxu3 %vm139_vm3, %v294_v49  ;;  %v384_v49 = vpop.permute.xlu0 %383 }
 0x385   : > { %563 = vmatmul.msk.f32.vlgmr.msra.gmra.mxu1 %vm139_vm3, %v981_v40 }
 0x386   : > { %560 = vmatmul.msk.f32.gmra.mxu3 %vm139_vm3, %v295_v4 }
 0x38e   : > { %561 = vmatmul.msk.f32.gmra.mxu3 %vm139_vm3, %v296_v7 }
 0x3f2   : > { %v339_v8 = vpop.f32.mrf.mxu0  ;;  %v345_v9 = vpop.f32.mrf.mxu1 }
 0x3f3   : > { %v340_v3 = vadd.f32 %v339_v8, %v297_v10  ;;  %v346_v55 = vadd.f32 %v345_v9, %v297_v10 }
 0x3f5   : > { %v363_v63 = vmax.f32 %v340_v3, 0.0  ;;  %v365_v58 = vmax.f32 %v346_v55, 0.0 }
 0x3f7   : > { %v411_v60 = vmul.f32 %v990_v1, %v363_v63  ;;  %v413_v2 = vmul.f32 %v384_v49, %v365_v58  ;;  %v404_v63 = vpop.permute.xlu2 %403 }
 0x3f9   : > { %v351_v62 = vpop.f32.mrf.mxu3 }
 0x3fa   : > { %v342_v0 = vpop.f32.mrf.mxu0  ;;  %v348_v56 = vpop.f32.mrf.mxu1  ;;  %v352_v4 = vadd.f32 %v351_v62, %v297_v10 }
 0x3fb   : > { %v343_v52 = vadd.f32 %v342_v0, %v297_v10  ;;  %v349_v59 = vadd.f32 %v348_v56, %v297_v10 }
 0x3fc   : > { %v367_v0 = vmax.f32 %v352_v4, 0.0 }
 0x3fd   : > { %v364_v54 = vmax.f32 %v343_v52, 0.0  ;;  %v366_v6 = vmax.f32 %v349_v59, 0.0  ;;  %v409_v59 = vpop.permute.xlu0 %408 }
 0x3ff   : > { %v412_v40 = vmul.f32 %v379_v51, %v364_v54  ;;  %v414_v52 = vmul.f32 %v993_v38, %v366_v6  ;;  %v415_v51 = vmul.f32 %v394_v5, %v367_v0  ;;  %v469_v38 = vperm.slane %v893_v36, 0 }
 0x401   : > { %v354_v57 = vpop.f32.mrf.mxu3  ;;  %v419_v61 = vmax.f32 %v411_v60, %v412_v40 }
 0x402   : > { %v355_v3 = vadd.f32 %v354_v57, %v297_v10  ;;  %v466_v57 = vpop.f32.mrf.mxu1 }
 0x403   : > { %v420_v7 = vmax.f32 %v419_v61, %v413_v2 }
 0x404   : > { %v368_v54 = vmax.f32 %v355_v3, 0.0 }
 0x405   : > { %v421_v11 = vmax.f32 %v420_v7, %v414_v52 }
 0x406   : > { %v416_v56 = vmul.f32 %v995_v39, %v368_v54 }
 0x407   : > { %v422_v1 = vmax.f32 %v421_v11, %v415_v51 }
 0x409   : > { %v357_v8 = vpop.f32.mrf.mxu3  ;;  %v423_v60 = vmax.f32 %v422_v1, %v416_v56 }
 0x40a   : > { %v358_v9 = vadd.f32 %v357_v8, %v297_v10 }
 0x40c   : > { %v369_v12 = vmax.f32 %v358_v9, 0.0 }
 0x40e   : > { %v417_v40 = vmul.f32 %v404_v63, %v369_v12  ;;  %v472_v12 = vperm.slane %v893_v36, 1 }
 0x410   : > { %v424_v49 = vmax.f32 %v423_v60, %v417_v40  ;;  %v1090_v40 = vmov %v997_v50 }
 0x411   : > { %v360_v55 = vpop.f32.mrf.mxu3 }
 0x412   : > { %v361_v62 = vadd.f32 %v360_v55, %v297_v10 }
 0x414   : > { %v370_v58 = vmax.f32 %v361_v62, 0.0 }
 0x416   : > { %v418_v61 = vmul.f32 %v409_v59, %v370_v58 }
 0x418   : > { %v425_v2 = vmax.f32 %v424_v49, %v418_v61 }
 0x41a   : > { %562 = vmatmul.msk.f32.vlgmr.msra.gmra.mxu0 %vm139_vm3, %v425_v2 }
 0x497   : > { %v446_v4 = vpop.f32.mrf.mxu0 }
 0x498   : > { %v467_v6 = vadd.f32 %v466_v57, %v446_v4 }
 0x49a   : > { %v470_v11 = vadd.f32 %v469_v38, %v467_v6  ;;  %v1089_v38 = vmov %v1004_v53 }
 0x49c   : > { %v471_v5 = vmax.f32 %v470_v11, 0.0 }
 0x49e   : > { %564 = vmatmul.msk.f32.vlgmr.msrb.gmra.mxu2 %vm473_vm9, %v471_v5 }
 0x521   : > { %v494_v39 = vpop.f32.mrf.mxu2 }
 0x522   : > { %v495_v10 = vadd.f32 %v494_v39, %v472_v12  ;;  %119 = sbr.rel (!%p117_p0) target bundleno = 30 (0x1e), region = 60 }
 0x524   : > { %v497_v7 = vmax.f32 %v495_v10, 0.0  }
 0x526   : > { %v1091_v39 = vmov %v497_v7  ;;  %507 = vst.msk [vmem:[#allocation8] sm:$0xff] (%p117_p0), %vm139_vm3, %v497_v7 }
 0x527   :  { %520 = dma.vmem_to_hbm [thread:$0]  %s516_s15, 128, %s518_s13, [#allocation4]  }
 0x528   :  { %756 = dma.done.wait [#allocation4], 128  }
 0x529   :  { %757 = vsyncadd [#allocation4], 4294967168 }
 0x52a   :  { %527 = vsyncpa [#allocation3], 1 }
 0x52b   :  { %528 = vsyncpa [#allocation6], 1 }
 0x52c   :  { %529 = vsyncpa [#allocation4], 1 }

</bundles_post_ra>
